<compile_context>
chip_gen: v5e
topology: v5e:2x2
jax: 0.10.0
libtpu: 0.0.40
codegen_flags: <defaults>
</compile_context>

<pallas_src>
import jax
import jax.numpy as jnp
from jax.experimental import pallas as pl
from jax.experimental.pallas import tpu as pltpu

_LANE = 128
_SUBLANE = 8


def _round_up(x, m):
    return (x + m - 1) // m * m


# ----------------------------------------------------------------------------
# Fused kernel: (Linear+BN+ReLU) * L  +  final Linear, all in one invocation.
# refs = [x, w0, b0, w1, b1, ..., w_out, b_out, o]
#   w*: bf16 (BN already folded in), b*: f32 (1, H) rows broadcasting over batch.
# ----------------------------------------------------------------------------
def _make_fused_kernel(num_hidden):
    def kernel(*refs):
        x_ref = refs[0]
        o_ref = refs[-1]
        h = x_ref[...].astype(jnp.bfloat16)          # MXU input dtype
        r = 1
        for _ in range(num_hidden):
            w_ref, b_ref = refs[r], refs[r + 1]
            r += 2
            z = jnp.dot(h, w_ref[...], preferred_element_type=jnp.float32)
            z = z + b_ref[...]                       # f32 epilogue (v5e-safe)
            h = jnp.maximum(z, 0.0).astype(jnp.bfloat16)
        w_ref, b_ref = refs[r], refs[r + 1]
        z = jnp.dot(h, w_ref[...], preferred_element_type=jnp.float32)
        o_ref[...] = (z + b_ref[...]).astype(o_ref.dtype)
    return kernel


# ----------------------------------------------------------------------------
# Wrapper: fold BN, cast weights to bf16, pad batch / output lanes, build grid.
# ----------------------------------------------------------------------------
@jax.jit
def fashion_forward(x, params):
    n, din = x.shape
    eps = jnp.float32(1e-5)

    # Fold eval-mode BatchNorm into the Linear weights/bias (done once, in JAX).
    #   scale = gamma / sqrt(var + eps)
    #   w' = w * scale ; b' = (b - mean) * scale + beta
    fused = []
    for (w, b, gamma, beta, mean, var) in params["hidden"]:
        scale = gamma * jax.lax.rsqrt(var + eps)                       # (1, H)
        w_f = (w * scale).astype(jnp.bfloat16)                         # (Din, H)
        b_f = ((b - mean) * scale + beta).astype(jnp.float32)          # (1, H)
        fused.append((w_f, b_f))

    # Final Linear, zero-padded to a lane-dense (multiple of 128) output width.
    w_out, b_out = params["out"]
    out_dim = w_out.shape[1]
    out_pad = _round_up(out_dim, _LANE)
    w_out_p = jnp.zeros((w_out.shape[0], out_pad), jnp.bfloat16)
    w_out_p = w_out_p.at[:, :out_dim].set(w_out.astype(jnp.bfloat16))
    b_out_p = jnp.zeros((1, out_pad), jnp.float32).at[:, :out_dim].set(b_out)

    # Batch padding + tiling (grid over batch; weights stay VMEM-resident).
    n_pad = _round_up(n, _SUBLANE)
    tile_n = min(n_pad, 256)
    n_pad = _round_up(n_pad, tile_n)
    x_p = jnp.zeros((n_pad, din), jnp.float32).at[:n, :].set(x)

    num_hidden = len(fused)
    kernel = _make_fused_kernel(num_hidden)

    operands = [x_p]
    in_specs = [pl.BlockSpec((tile_n, din), lambda i: (i, 0))]
    for (w_f, b_f) in fused:
        operands += [w_f, b_f]
        in_specs += [pl.BlockSpec(w_f.shape, lambda i: (0, 0)),
                     pl.BlockSpec(b_f.shape, lambda i: (0, 0))]
    operands += [w_out_p, b_out_p]
    in_specs += [pl.BlockSpec(w_out_p.shape, lambda i: (0, 0)),
                 pl.BlockSpec(b_out_p.shape, lambda i: (0, 0))]

    out = pl.pallas_call(
        kernel,
        out_shape=jax.ShapeDtypeStruct((n_pad, out_pad), jnp.float32),
        grid=(n_pad // tile_n,),
        in_specs=in_specs,
        out_specs=pl.BlockSpec((tile_n, out_pad), lambda i: (i, 0)),
        compiler_params=pltpu.CompilerParams(
            dimension_semantics=("parallel",)),
    )(*operands)

    return out[:n, :out_dim]


# ----------------------------------------------------------------------------
# Parameter construction (mirrors nn.Linear / nn.BatchNorm1d default init).
# Weights stored as (in_features, out_features) so the kernel computes x @ W + b.
# ----------------------------------------------------------------------------
def init_params(key, input_dim, output_dim, num_hidden_layers, neurons_per_layer):
    params = {"hidden": [], "out": None}
    d_in = input_dim
    for _ in range(num_hidden_layers):
        key, kw, kb = jax.random.split(key, 3)
        bound = 1.0 / jnp.sqrt(jnp.float32(d_in))
        w = jax.random.uniform(kw, (d_in, neurons_per_layer), jnp.float32,
                               minval=-bound, maxval=bound)
        b = jax.random.uniform(kb, (1, neurons_per_layer), jnp.float32,
                               minval=-bound, maxval=bound)
        gamma = jnp.ones((1, neurons_per_layer), jnp.float32)
        beta = jnp.zeros((1, neurons_per_layer), jnp.float32)
        mean = jnp.zeros((1, neurons_per_layer), jnp.float32)
        var = jnp.ones((1, neurons_per_layer), jnp.float32)
        params["hidden"].append((w, b, gamma, beta, mean, var))
        d_in = neurons_per_layer
    key, kw, kb = jax.random.split(key, 3)
    bound = 1.0 / jnp.sqrt(jnp.float32(d_in))
    w = jax.random.uniform(kw, (d_in, output_dim), jnp.float32,
                           minval=-bound, maxval=bound)
    b = jax.random.uniform(kb, (1, output_dim), jnp.float32,
                           minval=-bound, maxval=bound)
    params["out"] = (w, b)
    return params


# ----------------------------------------------------------------------------
# Pure-JAX references for correctness checking.
# ----------------------------------------------------------------------------
def fashion_forward_ref_bf16(x, params):
    """Same math as the kernel (BN folded, bf16 matmuls, f32 accumulate)."""
    eps = jnp.float32(1e-5)
    h = x
    for (w, b, gamma, beta, mean, var) in params["hidden"]:
        scale = gamma * jax.lax.rsqrt(var + eps)
        w_f = (w * scale).astype(jnp.bfloat16)
        b_f = (b - mean) * scale + beta
        z = jnp.dot(h.astype(jnp.bfloat16), w_f,
                    preferred_element_type=jnp.float32) + b_f
        h = jnp.maximum(z, 0.0)
    w, b = params["out"]
    return jnp.dot(h.astype(jnp.bfloat16), w.astype(jnp.bfloat16),
                   preferred_element_type=jnp.float32) + b


def fashion_forward_ref_f32(x, params):
    """Full-precision reference of the original module (eval mode)."""
    h = x
    for (w, b, gamma, beta, mean, var) in params["hidden"]:
        z = h @ w + b
        z = (z - mean) * jax.lax.rsqrt(var + 1e-5) * gamma + beta
        h = jnp.maximum(z, 0.0)
    w, b = params["out"]
    return h @ w + b


# ----------------------------------------------------------------------------
if __name__ == "__main__":
    # Shapes consistent with the module's constructor:
    #   input_dim=128, output_dim=10, num_hidden_layers=2, neurons_per_layer=128
    batch = 8
    input_dim = 128
    output_dim = 10
    num_hidden_layers = 2
    neurons_per_layer = 128
    # dropout_rate only matters in training mode; eval-mode dropout is identity.

    key = jax.random.PRNGKey(0)
    key, kx = jax.random.split(key)
    x = jax.random.normal(kx, (batch, input_dim), jnp.float32)

    params = init_params(key, input_dim, output_dim,
                         num_hidden_layers, neurons_per_layer)

    out = fashion_forward(x, params)
    out = jax.block_until_ready(out)

    assert out.shape == (batch, output_dim), out.shape

    # Tight check vs. a JAX reference using identical bf16/fold math.
    ref_bf16 = fashion_forward_ref_bf16(x, params)
    assert jnp.allclose(out, ref_bf16, atol=5e-3, rtol=5e-3), \
        "mismatch vs bf16 reference"

    # Looser check vs. the exact f32 module semantics (bf16 matmul rounding).
    ref_f32 = fashion_forward_ref_f32(x, params)
    assert jnp.allclose(out, ref_f32, atol=5e-2, rtol=5e-2), \
        "mismatch vs f32 reference"

    print("KERNEL_OK")
</pallas_src>

<mosaic_0001>
module attributes {stable_mosaic.version = 11 : i64} {
  func.func @kernel(%arg0: i32, %arg1: memref<8x128xf32, #tpu.memory_space<vmem>>, %arg2: memref<128x128xbf16, #tpu.memory_space<vmem>>, %arg3: memref<1x128xf32, #tpu.memory_space<vmem>>, %arg4: memref<128x128xbf16, #tpu.memory_space<vmem>>, %arg5: memref<1x128xf32, #tpu.memory_space<vmem>>, %arg6: memref<128x128xbf16, #tpu.memory_space<vmem>>, %arg7: memref<1x128xf32, #tpu.memory_space<vmem>>, %arg8: memref<8x128xf32, #tpu.memory_space<vmem>>) attributes {dimension_semantics = [#tpu.dimension_semantics<parallel>], iteration_bounds = array<i64: 1>, scalar_prefetch = 0 : i64, scratch_operands = 0 : i64, tpu.core_type = #tpu.core_type<tc>, window_params = [{transform_indices = @transform_0, window_bounds = array<i64: 8, 128>}, {pipeline_mode = #tpu.pipeline_mode<synchronous>, transform_indices = @transform_1, window_bounds = array<i64: 128, 128>}, {pipeline_mode = #tpu.pipeline_mode<synchronous>, transform_indices = @transform_2, window_bounds = array<i64: 1, 128>}, {pipeline_mode = #tpu.pipeline_mode<synchronous>, transform_indices = @transform_3, window_bounds = array<i64: 128, 128>}, {pipeline_mode = #tpu.pipeline_mode<synchronous>, transform_indices = @transform_4, window_bounds = array<i64: 1, 128>}, {pipeline_mode = #tpu.pipeline_mode<synchronous>, transform_indices = @transform_5, window_bounds = array<i64: 128, 128>}, {pipeline_mode = #tpu.pipeline_mode<synchronous>, transform_indices = @transform_6, window_bounds = array<i64: 1, 128>}, {transform_indices = @transform_7, window_bounds = array<i64: 8, 128>}]} {
    %c0 = arith.constant 0 : index
    %c0_0 = arith.constant 0 : index
    %0 = vector.load %arg1[%c0, %c0_0] : memref<8x128xf32, #tpu.memory_space<vmem>>, vector<8x128xf32>
    %1 = arith.truncf %0 : vector<8x128xf32> to vector<8x128xbf16>
    %c0_1 = arith.constant 0 : index
    %c0_2 = arith.constant 0 : index
    %2 = vector.load %arg2[%c0_1, %c0_2] : memref<128x128xbf16, #tpu.memory_space<vmem>>, vector<128x128xbf16>
    %cst = arith.constant dense<0.000000e+00> : vector<8x128xf32>
    %3 = tpu.matmul %1, %2, %cst {dimension_numbers = #tpu.dot_dimension_numbers<[1], [0], [0], [1], [0, 0, 1, 1], [], []>} : vector<8x128xbf16>, vector<128x128xbf16>, vector<8x128xf32> -> vector<8x128xf32>
    %c0_3 = arith.constant 0 : index
    %c0_4 = arith.constant 0 : index
    %4 = vector.load %arg3[%c0_3, %c0_4] : memref<1x128xf32, #tpu.memory_space<vmem>>, vector<1x128xf32>
    %5 = vector.broadcast %4 : vector<1x128xf32> to vector<8x128xf32>
    %6 = arith.addf %3, %5 : vector<8x128xf32>
    %cst_5 = arith.constant 0.000000e+00 : f32
    %7 = vector.broadcast %cst_5 : f32 to vector<8x128xf32>
    %8 = arith.maximumf %6, %7 : vector<8x128xf32>
    %9 = arith.truncf %8 : vector<8x128xf32> to vector<8x128xbf16>
    %c0_6 = arith.constant 0 : index
    %c0_7 = arith.constant 0 : index
    %10 = vector.load %arg4[%c0_6, %c0_7] : memref<128x128xbf16, #tpu.memory_space<vmem>>, vector<128x128xbf16>
    %cst_8 = arith.constant dense<0.000000e+00> : vector<8x128xf32>
    %11 = tpu.matmul %9, %10, %cst_8 {dimension_numbers = #tpu.dot_dimension_numbers<[1], [0], [0], [1], [0, 0, 1, 1], [], []>} : vector<8x128xbf16>, vector<128x128xbf16>, vector<8x128xf32> -> vector<8x128xf32>
    %c0_9 = arith.constant 0 : index
    %c0_10 = arith.constant 0 : index
    %12 = vector.load %arg5[%c0_9, %c0_10] : memref<1x128xf32, #tpu.memory_space<vmem>>, vector<1x128xf32>
    %13 = vector.broadcast %12 : vector<1x128xf32> to vector<8x128xf32>
    %14 = arith.addf %11, %13 : vector<8x128xf32>
    %cst_11 = arith.constant 0.000000e+00 : f32
    %15 = vector.broadcast %cst_11 : f32 to vector<8x128xf32>
    %16 = arith.maximumf %14, %15 : vector<8x128xf32>
    %17 = arith.truncf %16 : vector<8x128xf32> to vector<8x128xbf16>
    %c0_12 = arith.constant 0 : index
    %c0_13 = arith.constant 0 : index
    %18 = vector.load %arg6[%c0_12, %c0_13] : memref<128x128xbf16, #tpu.memory_space<vmem>>, vector<128x128xbf16>
    %cst_14 = arith.constant dense<0.000000e+00> : vector<8x128xf32>
    %19 = tpu.matmul %17, %18, %cst_14 {dimension_numbers = #tpu.dot_dimension_numbers<[1], [0], [0], [1], [0, 0, 1, 1], [], []>} : vector<8x128xbf16>, vector<128x128xbf16>, vector<8x128xf32> -> vector<8x128xf32>
    %c0_15 = arith.constant 0 : index
    %c0_16 = arith.constant 0 : index
    %20 = vector.load %arg7[%c0_15, %c0_16] : memref<1x128xf32, #tpu.memory_space<vmem>>, vector<1x128xf32>
    %21 = vector.broadcast %20 : vector<1x128xf32> to vector<8x128xf32>
    %22 = arith.addf %19, %21 : vector<8x128xf32>
    %c0_17 = arith.constant 0 : index
    %c0_18 = arith.constant 0 : index
    %23 = vector.load %arg8[%c0_17, %c0_18] : memref<8x128xf32, #tpu.memory_space<vmem>>, vector<8x128xf32>
    tpu.vector_store %arg8[%c0_17, %c0_18], %22 {strides = array<i32>} : memref<8x128xf32, #tpu.memory_space<vmem>>, vector<8x128xf32>,
    return
  }
  func.func @transform_0(%arg0: i32) -> (i32, i32) {
    %c0_i32 = arith.constant 0 : i32
    %c0_i32_0 = arith.constant 0 : i32
    return %arg0, %c0_i32 : i32, i32
  }
  func.func @transform_1(%arg0: i32) -> (i32, i32) {
    %c0_i32 = arith.constant 0 : i32
    %c0_i32_0 = arith.constant 0 : i32
    %c0_i32_1 = arith.constant 0 : i32
    return %c0_i32, %c0_i32_0 : i32, i32
  }
  func.func @transform_2(%arg0: i32) -> (i32, i32) {
    %c0_i32 = arith.constant 0 : i32
    %c0_i32_0 = arith.constant 0 : i32
    %c0_i32_1 = arith.constant 0 : i32
    return %c0_i32, %c0_i32_0 : i32, i32
  }
  func.func @transform_3(%arg0: i32) -> (i32, i32) {
    %c0_i32 = arith.constant 0 : i32
    %c0_i32_0 = arith.constant 0 : i32
    %c0_i32_1 = arith.constant 0 : i32
    return %c0_i32, %c0_i32_0 : i32, i32
  }
  func.func @transform_4(%arg0: i32) -> (i32, i32) {
    %c0_i32 = arith.constant 0 : i32
    %c0_i32_0 = arith.constant 0 : i32
    %c0_i32_1 = arith.constant 0 : i32
    return %c0_i32, %c0_i32_0 : i32, i32
  }
  func.func @transform_5(%arg0: i32) -> (i32, i32) {
    %c0_i32 = arith.constant 0 : i32
    %c0_i32_0 = arith.constant 0 : i32
    %c0_i32_1 = arith.constant 0 : i32
    return %c0_i32, %c0_i32_0 : i32, i32
  }
  func.func @transform_6(%arg0: i32) -> (i32, i32) {
    %c0_i32 = arith.constant 0 : i32
    %c0_i32_0 = arith.constant 0 : i32
    %c0_i32_1 = arith.constant 0 : i32
    return %c0_i32, %c0_i32_0 : i32, i32
  }
  func.func @transform_7(%arg0: i32) -> (i32, i32) {
    %c0_i32 = arith.constant 0 : i32
    %c0_i32_0 = arith.constant 0 : i32
    return %arg0, %c0_i32 : i32, i32
  }
}

</mosaic_0001>

<bundles_post_ra>
// kernel: fashion_forward.1
= control target key start
LH: loop header
LB: loop body
LE: loop exit
PB: predicated region body
PF: predicated region fallthrough
CT: control target
= control target key end

     0   :  { %s571_s0 = inlined_call_operand.vmem [shape: f32[8,128], index: 0, kind: input, shape index: {}]   ;;  %s572_s1 = inlined_call_operand.vmem [shape: bf16[128,128], index: 1, kind: input, shape index: {}]   ;;  %s573_s2 = inlined_call_operand.vmem [shape: f32[1,128], index: 2, kind: input, shape index: {}]   ;;  %s574_s3 = inlined_call_operand.vmem [shape: bf16[128,128], index: 3, kind: input, shape index: {}]   ;;  %s575_s4 = inlined_call_operand.vmem [shape: f32[1,128], index: 4, kind: input, shape index: {}]   ;;  %s576_s5 = inlined_call_operand.vmem [shape: bf16[128,128], index: 5, kind: input, shape index: {}]   ;;  %s577_s6 = inlined_call_operand.vmem [shape: f32[1,128], index: 6, kind: input, shape index: {}]   ;;  %s578_s7 = inlined_call_operand.hbm [shape: f32[8,128], index: 7, kind: output, shape index: {}]  }
   0x1   :  { %v396_v0 = vld [vmem:[%s572_s1 + $0x38] sm:$0xff]  ;;  %v395_v1 = vld [vmem:[%s572_s1 + $0x30] sm:$0xff]  ;;  %v394_v4 = vld [vmem:[%s572_s1 + $0x28] sm:$0xff] }
   0x2   :  { %97 = vmatpush.bf16.msra.mxu0 %v396_v0  ;;  %v404_v2 = vld [vmem:[%s574_s3 + $0x38] sm:$0xff]  ;;  %v403_v3 = vld [vmem:[%s574_s3 + $0x30] sm:$0xff] }
   0x3   :  { %180 = vmatpush.bf16.msra.mxu1 %v404_v2 }
   0x6   :  { %98 = vmatpush.bf16.msra.mxu0 %v395_v1 }
   0x7   :  { %12 = vsyncpa [#allocation3], 0  ;;  %181 = vmatpush.bf16.msra.mxu1 %v403_v3  ;;  %v402_v5 = vld [vmem:[%s574_s3 + $0x28] sm:$0xff]  ;;  %v393_v6 = vld [vmem:[%s572_s1 + $0x20] sm:$0xff]  ;;  %s443_s30 = smov [#allocation2]  }
   0x8   :  { %v401_v7 = vld [vmem:[%s574_s3 + $0x20] sm:$0xff]  ;;  %v392_v8 = vld [vmem:[%s572_s1 + $0x18] sm:$0xff]  ;;  %v391_v10 = vld [vmem:[%s572_s1 + $0x10] sm:$0xff]  ;;  %s282_s8 = sshll.u32 %s443_s30, 4  ;;  %s283_s8 = int_to_ptr.vmem [resolvable:$true] %s282_s8 }
   0x9   :  { %v400_v9 = vld [vmem:[%s574_s3 + $0x18] sm:$0xff]  ;;  %v399_v11 = vld [vmem:[%s574_s3 + $0x10] sm:$0xff]  ;;  %v390_v12 = vld [vmem:[%s572_s1 + $0x8] sm:$0xff] }
   0xa   :  { %99 = vmatpush.bf16.msra.mxu0 %v394_v4  ;;  %v389_v13 = vld [vmem:[%s572_s1] sm:$0xff]  ;;  %v398_v16 = vld [vmem:[%s574_s3 + $0x8] sm:$0xff]  ;;  %v412_v18 = vld [vmem:[%s576_s5 + $0x38] sm:$0xff] }
   0xb   :  { %182 = vmatpush.bf16.msra.mxu1 %v402_v5  ;;  %v27_v14 = vld [vmem:[%s571_s0] sm:$0xff]  ;;  %263 = vmatpush.bf16.msra.mxu2 %v412_v18  ;;  %v411_v19 = vld [vmem:[%s576_s5 + $0x30] sm:$0xff]  ;;  %v410_v20 = vld [vmem:[%s576_s5 + $0x28] sm:$0xff] }
   0xc   :  { %v28_v15 = vpack.c.bf16 %v27_v14, %v27_v14  ;;  %v397_v17 = vld [vmem:[%s574_s3] sm:$0xff]  ;;  %v408_v22 = vld [vmem:[%s576_s5 + $0x18] sm:$0xff]  ;;  %v407_v23 = vld [vmem:[%s576_s5 + $0x10] sm:$0xff] }
   0xd   :  { %v409_v21 = vld [vmem:[%s576_s5 + $0x20] sm:$0xff]  ;;  %v406_v30 = vld [vmem:[%s576_s5 + $0x8] sm:$0xff] }
   0xe   :  { %100 = vmatpush.bf16.msra.mxu0 %v393_v6  ;;  %v414_v24 = vld [vmem:[%s573_s2] ss:$0 sm:$0xff] }
   0xf   :  { %183 = vmatpush.bf16.msra.mxu1 %v401_v7  ;;  %264 = vmatpush.bf16.msra.mxu2 %v411_v19  ;;  %v405_v31 = vld [vmem:[%s576_s5] sm:$0xff]  ;;  %s284_s5 = sshll.u32 %s578_s7, 4  ;;  %s285_s5 = int_to_ptr.hbm [resolvable:$true] %s284_s5 }
  0x10   :  { %v415_v32 = vld [vmem:[%s575_s4] ss:$0 sm:$0xff] }
  0x11   :  { %v416_v38 = vld [vmem:[%s577_s6] ss:$0 sm:$0xff] }
  0x12   :  { %101 = vmatpush.bf16.msra.mxu0 %v392_v8 }
  0x13   :  { %184 = vmatpush.bf16.msra.mxu1 %v400_v9  ;;  %265 = vmatpush.bf16.msra.mxu2 %v410_v20 }
  0x16   :  { %102 = vmatpush.bf16.msra.mxu0 %v391_v10 }
  0x17   :  { %185 = vmatpush.bf16.msra.mxu1 %v399_v11  ;;  %266 = vmatpush.bf16.msra.mxu2 %v409_v21 }
  0x1a   :  { %103 = vmatpush.bf16.msra.mxu0 %v390_v12 }
  0x1b   :  { %186 = vmatpush.bf16.msra.mxu1 %v398_v16  ;;  %267 = vmatpush.bf16.msra.mxu2 %v408_v22 }
  0x1e   :  { %104 = vmatpush.bf16.msra.mxu0 %v389_v13 }
  0x1f   :  { %187 = vmatpush.bf16.msra.mxu1 %v397_v17  ;;  %268 = vmatpush.bf16.msra.mxu2 %v407_v23 }
  0x21   :  { %105 = vmatmul.bf16.vlgmr.msra.gmra.mxu0 %v28_v15 }
  0x23   :  { %269 = vmatpush.bf16.msra.mxu2 %v406_v30 }
  0x27   :  { %270 = vmatpush.bf16.msra.mxu2 %v405_v31 }
  0x9e   :  { %v106_v25 = vpop.f32.mrf.mxu0 }
  0x9f   :  { %v107_v26 = vadd.f32 %v414_v24, %v106_v25 }
  0xa1   :  { %v110_v27 = vmax.f32 %v107_v26, 0.0 }
  0xa3   :  { %v111_v28 = vpack.c.bf16 %v110_v27, %v110_v27 }
  0xa5   :  { %188 = vmatmul.bf16.vlgmr.msra.gmra.mxu1 %v111_v28 }
  0xa6   :  { %v108_v29 = vpop.f32.mrf.mxu0 }
 0x122   :  { %v189_v33 = vpop.f32.mrf.mxu1 }
 0x123   :  { %v190_v34 = vadd.f32 %v415_v32, %v189_v33 }
 0x125   :  { %v193_v35 = vmax.f32 %v190_v34, 0.0 }
 0x127   :  { %v194_v36 = vpack.c.bf16 %v193_v35, %v193_v35 }
 0x129   :  { %271 = vmatmul.bf16.vlgmr.msra.gmra.mxu2 %v194_v36 }
 0x12a   :  { %v191_v37 = vpop.f32.mrf.mxu1 }
 0x1ac   :  { %v272_v39 = vpop.f32.mrf.mxu2 }
 0x1ad   :  { %v273_v40 = vadd.f32 %v416_v38, %v272_v39 }
 0x1af   :  { %276 = vst [vmem:[#allocation2] sm:$0xff] %v273_v40 }
 0x1b0   :  { %287 = dma.vmem_to_hbm [thread:$0]  %s283_s8, 128, %s285_s5, [#allocation3]  }
 0x1b4   :  { %v274_v41 = vpop.f32.mrf.mxu2 }
 0x1b5   :  { %441 = dma.done.wait [#allocation3], 128  }
 0x1b6   :  { %442 = vsyncadd [#allocation3], 4294967168 }
 0x1b7   :  { %292 = vsyncpa [#allocation3], 1 }

</bundles_post_ra>
